<compile_context>
chip_gen: v5e
topology: v5e:2x2
jax: 0.10.0
libtpu: 0.0.40
codegen_flags: <defaults>
</compile_context>

<pallas_src>
import functools

import jax
import jax.numpy as jnp
from jax.experimental import pallas as pl
from jax.experimental.pallas import tpu as pltpu


def _kan_fused_kernel(x_ref, *refs, order, r0, r1, zoom, pan, use_bf16):
    """Fused forward over all layers. refs = (*w_refs, o_ref).

    x_ref : (TB, I0)                 activation tile
    w_ref : ((order+1)*I_l, O_l)     pre-fused weight of layer l (full block)
    o_ref : (TB, O_last)
    """
    w_refs = refs[:-1]
    o_ref = refs[-1]
    x = x_ref[...].astype(jnp.float32)                       # (TB, I0)

    for w_ref in w_refs:                                     # static unroll over layers
        xt = jnp.tanh(x) * zoom + pan
        x_a = xt - r0
        x_b = r1 - xt

        if order == 0:
            ber = jnp.ones_like(x_a)
        else:
            # Incremental powers 1..order (x^0 never materialized).
            xa_p = [x_a]
            xb_p = [x_b]
            for _ in range(order - 1):
                xa_p.append(xa_p[-1] * x_a)
                xb_p.append(xb_p[-1] * x_b)
            blocks = []
            for i in range(order + 1):
                if i == 0:
                    blocks.append(xb_p[order - 1])                    # x_b^order
                elif i == order:
                    blocks.append(xa_p[order - 1])                    # x_a^order
                else:
                    blocks.append(xa_p[i - 1] * xb_p[order - i - 1])  # x_a^i x_b^(o-i)
            # (TB, (order+1)*I_l); column index = i*I_l + k, matching the fused weight rows.
            ber = jnp.concatenate(blocks, axis=-1)

        w = w_ref[...]                                       # ((order+1)*I_l, O_l)
        if use_bf16:
            ber = ber.astype(jnp.bfloat16)
            w = w.astype(jnp.bfloat16)
        # One MXU matmul per layer, fp32 accumulation.
        x = jnp.dot(ber, w, preferred_element_type=jnp.float32)   # (TB, O_l)

    o_ref[...] = x.astype(o_ref.dtype)


def bernstein_kan_forward(x, w_mats, order, inter_range, *, use_bf16=False):
    """Run the whole KAN stack in one pallas_call.

    x      : (B, I0)
    w_mats : list of ((order+1)*I_l, O_l) pre-fused weights (built once in __init__)
    """
    B, I0 = x.shape
    O_last = w_mats[-1].shape[1]
    r0, r1 = float(inter_range[0]), float(inter_range[-1])
    zoom = (r1 - r0) / 2.0
    pan = (r1 + r0) / 2.0

    # Batch tiling: single full-batch block for small B; 128-row tiles (padded)
    # for large B so the "parallel" grid axis can spread across TensorCores.
    if B <= 128:
        TB = B
        xp = x
    else:
        TB = 128
        pad = (-B) % TB
        xp = jnp.pad(x, ((0, pad), (0, 0))) if pad else x
    Bp = xp.shape[0]
    grid = (Bp // TB,)

    kernel = functools.partial(_kan_fused_kernel, order=order, r0=r0, r1=r1,
                               zoom=zoom, pan=pan, use_bf16=use_bf16)

    in_specs = [pl.BlockSpec((TB, I0), lambda b: (b, 0))]
    # Full weight blocks; index_map ignores the batch index -> weights stay resident.
    in_specs += [pl.BlockSpec(w.shape, lambda b: (0, 0)) for w in w_mats]

    out = pl.pallas_call(
        kernel,
        out_shape=jax.ShapeDtypeStruct((Bp, O_last), x.dtype),
        grid=grid,
        in_specs=in_specs,
        out_specs=pl.BlockSpec((TB, O_last), lambda b: (b, 0)),
        compiler_params=pltpu.CompilerParams(
            dimension_semantics=("parallel",)),
    )(xp, *w_mats)

    return out[:B] if Bp != B else out


class BernsteinKANPallas:
    """Pallas port of BernsteinKAN: a stack of CustomBernsteinLayer, fused into one kernel."""

    def __init__(self, layer_sizes, order=5, inter_range=(0.0, 1.0), key=None,
                 use_bf16_matmul=False):
        self.layer_sizes = list(layer_sizes)
        self.order = order
        self.inter_range = (float(inter_range[0]), float(inter_range[-1]))
        self.use_bf16_matmul = use_bf16_matmul
        if key is None:
            key = jax.random.PRNGKey(0)
        self.coefs = []    # original layout (O, I, order+1), kept for the reference check
        self.w_mats = []   # fused layout ((order+1)*I, O), computed ONCE here (not per forward)
        for i in range(1, len(layer_sizes)):
            key, sub = jax.random.split(key)
            O, I = layer_sizes[i], layer_sizes[i - 1]
            coef = 0.1 * jax.random.normal(sub, (O, I, order + 1), jnp.float32)
            self.coefs.append(coef)
            # (O, I, order+1) -> (order+1, I, O) -> ((order+1)*I, O)
            w = jnp.transpose(coef, (2, 1, 0)).reshape((order + 1) * I, O)
            self.w_mats.append(w)

    def __call__(self, x):
        return bernstein_kan_forward(x, self.w_mats, self.order, self.inter_range,
                                     use_bf16=self.use_bf16_matmul)


# ----------------------- Pure-JAX reference (PyTorch math) -----------------------
def _ref_layer(x, coef, order, inter_range):
    r0, r1 = float(inter_range[0]), float(inter_range[-1])
    zoom = (r1 - r0) / 2.0
    pan = (r1 + r0) / 2.0
    xt = jnp.tanh(x) * zoom + pan
    x_a = xt - r0
    x_b = r1 - xt
    ber = jnp.stack([x_a ** i * x_b ** (order - i) for i in range(order + 1)],
                    axis=2)                                   # (B, I, order+1)
    return jnp.einsum('bki,jki->bj', ber, coef)


def _ref_kan(x, coefs, order, inter_range):
    for coef in coefs:
        x = _ref_layer(x, coef, order, inter_range)
    return x


if __name__ == "__main__":
    key = jax.random.PRNGKey(0)
    k_x, k_params = jax.random.split(key)

    # Small shapes consistent with the module: KAN over flat feature vectors.
    layer_sizes = [4, 32, 8]
    order = 5
    inter_range = (0.0, 1.0)
    batch = 8

    x = jax.random.normal(k_x, (batch, layer_sizes[0]), jnp.float32)

    model = BernsteinKANPallas(layer_sizes, order=order,
                               inter_range=inter_range, key=k_params)

    out = model(x)
    out = jax.block_until_ready(out)

    ref = _ref_kan(x, model.coefs, order, inter_range)
    assert out.shape == (batch, layer_sizes[-1])
    assert jnp.allclose(out, ref, atol=1e-5, rtol=1e-5), (out, ref)

    print("KERNEL_OK")
</pallas_src>

<mosaic_0001>
module attributes {stable_mosaic.version = 11 : i64} {
  func.func @_kan_fused_kernel(%arg0: i32, %arg1: memref<8x4xf32, #tpu.memory_space<vmem>>, %arg2: memref<24x32xf32, #tpu.memory_space<vmem>>, %arg3: memref<192x8xf32, #tpu.memory_space<vmem>>, %arg4: memref<8x8xf32, #tpu.memory_space<vmem>>) attributes {dimension_semantics = [#tpu.dimension_semantics<parallel>], iteration_bounds = array<i64: 1>, scalar_prefetch = 0 : i64, scratch_operands = 0 : i64, tpu.core_type = #tpu.core_type<tc>, window_params = [{transform_indices = @transform_0, window_bounds = array<i64: 8, 4>}, {pipeline_mode = #tpu.pipeline_mode<synchronous>, transform_indices = @transform_1, window_bounds = array<i64: 24, 32>}, {pipeline_mode = #tpu.pipeline_mode<synchronous>, transform_indices = @transform_2, window_bounds = array<i64: 192, 8>}, {transform_indices = @transform_3, window_bounds = array<i64: 8, 8>}]} {
    %c0 = arith.constant 0 : index
    %c0_0 = arith.constant 0 : index
    %0 = vector.load %arg1[%c0, %c0_0] : memref<8x4xf32, #tpu.memory_space<vmem>>, vector<8x4xf32>
    %1 = math.tanh %0 : vector<8x4xf32>
    %cst = arith.constant 5.000000e-01 : f32
    %2 = vector.broadcast %cst : f32 to vector<8x4xf32>
    %3 = arith.mulf %1, %2 : vector<8x4xf32>
    %cst_1 = arith.constant 5.000000e-01 : f32
    %4 = vector.broadcast %cst_1 : f32 to vector<8x4xf32>
    %5 = arith.addf %3, %4 : vector<8x4xf32>
    %cst_2 = arith.constant 0.000000e+00 : f32
    %6 = vector.broadcast %cst_2 : f32 to vector<8x4xf32>
    %7 = arith.subf %5, %6 : vector<8x4xf32>
    %cst_3 = arith.constant 1.000000e+00 : f32
    %8 = vector.broadcast %cst_3 : f32 to vector<8x4xf32>
    %9 = arith.subf %8, %5 : vector<8x4xf32>
    %10 = arith.mulf %7, %7 : vector<8x4xf32>
    %11 = arith.mulf %9, %9 : vector<8x4xf32>
    %12 = arith.mulf %10, %7 : vector<8x4xf32>
    %13 = arith.mulf %11, %9 : vector<8x4xf32>
    %14 = arith.mulf %12, %7 : vector<8x4xf32>
    %15 = arith.mulf %13, %9 : vector<8x4xf32>
    %16 = arith.mulf %14, %7 : vector<8x4xf32>
    %17 = arith.mulf %15, %9 : vector<8x4xf32>
    %18 = arith.mulf %7, %15 : vector<8x4xf32>
    %19 = arith.mulf %10, %13 : vector<8x4xf32>
    %20 = arith.mulf %12, %11 : vector<8x4xf32>
    %21 = arith.mulf %14, %9 : vector<8x4xf32>
    %22 = tpu.concatenate %17, %18, %19, %20, %21, %16 in 1 : vector<8x4xf32>, vector<8x4xf32>, vector<8x4xf32>, vector<8x4xf32>, vector<8x4xf32>, vector<8x4xf32> -> vector<8x24xf32>
    %c0_4 = arith.constant 0 : index
    %c0_5 = arith.constant 0 : index
    %23 = vector.load %arg2[%c0_4, %c0_5] : memref<24x32xf32, #tpu.memory_space<vmem>>, vector<24x32xf32>
    %cst_6 = arith.constant dense<0.000000e+00> : vector<8x32xf32>
    %24 = tpu.matmul %22, %23, %cst_6 {dimension_numbers = #tpu.dot_dimension_numbers<[1], [0], [0], [1], [0, 0, 1, 1], [], []>} : vector<8x24xf32>, vector<24x32xf32>, vector<8x32xf32> -> vector<8x32xf32>
    %25 = math.tanh %24 : vector<8x32xf32>
    %cst_7 = arith.constant 5.000000e-01 : f32
    %26 = vector.broadcast %cst_7 : f32 to vector<8x32xf32>
    %27 = arith.mulf %25, %26 : vector<8x32xf32>
    %cst_8 = arith.constant 5.000000e-01 : f32
    %28 = vector.broadcast %cst_8 : f32 to vector<8x32xf32>
    %29 = arith.addf %27, %28 : vector<8x32xf32>
    %cst_9 = arith.constant 0.000000e+00 : f32
    %30 = vector.broadcast %cst_9 : f32 to vector<8x32xf32>
    %31 = arith.subf %29, %30 : vector<8x32xf32>
    %cst_10 = arith.constant 1.000000e+00 : f32
    %32 = vector.broadcast %cst_10 : f32 to vector<8x32xf32>
    %33 = arith.subf %32, %29 : vector<8x32xf32>
    %34 = arith.mulf %31, %31 : vector<8x32xf32>
    %35 = arith.mulf %33, %33 : vector<8x32xf32>
    %36 = arith.mulf %34, %31 : vector<8x32xf32>
    %37 = arith.mulf %35, %33 : vector<8x32xf32>
    %38 = arith.mulf %36, %31 : vector<8x32xf32>
    %39 = arith.mulf %37, %33 : vector<8x32xf32>
    %40 = arith.mulf %38, %31 : vector<8x32xf32>
    %41 = arith.mulf %39, %33 : vector<8x32xf32>
    %42 = arith.mulf %31, %39 : vector<8x32xf32>
    %43 = arith.mulf %34, %37 : vector<8x32xf32>
    %44 = arith.mulf %36, %35 : vector<8x32xf32>
    %45 = arith.mulf %38, %33 : vector<8x32xf32>
    %46 = tpu.concatenate %41, %42, %43, %44, %45, %40 in 1 : vector<8x32xf32>, vector<8x32xf32>, vector<8x32xf32>, vector<8x32xf32>, vector<8x32xf32>, vector<8x32xf32> -> vector<8x192xf32>
    %c0_11 = arith.constant 0 : index
    %c0_12 = arith.constant 0 : index
    %47 = vector.load %arg3[%c0_11, %c0_12] : memref<192x8xf32, #tpu.memory_space<vmem>>, vector<192x8xf32>
    %cst_13 = arith.constant dense<0.000000e+00> : vector<8x8xf32>
    %48 = tpu.matmul %46, %47, %cst_13 {dimension_numbers = #tpu.dot_dimension_numbers<[1], [0], [0], [1], [0, 0, 1, 1], [], []>} : vector<8x192xf32>, vector<192x8xf32>, vector<8x8xf32> -> vector<8x8xf32>
    %c0_14 = arith.constant 0 : index
    %c0_15 = arith.constant 0 : index
    %49 = vector.load %arg4[%c0_14, %c0_15] : memref<8x8xf32, #tpu.memory_space<vmem>>, vector<8x8xf32>
    tpu.vector_store %arg4[%c0_14, %c0_15], %48 {strides = array<i32>} : memref<8x8xf32, #tpu.memory_space<vmem>>, vector<8x8xf32>,
    return
  }
  func.func @transform_0(%arg0: i32) -> (i32, i32) {
    %c0_i32 = arith.constant 0 : i32
    %c0_i32_0 = arith.constant 0 : i32
    return %arg0, %c0_i32 : i32, i32
  }
  func.func @transform_1(%arg0: i32) -> (i32, i32) {
    %c0_i32 = arith.constant 0 : i32
    %c0_i32_0 = arith.constant 0 : i32
    %c0_i32_1 = arith.constant 0 : i32
    return %c0_i32, %c0_i32_0 : i32, i32
  }
  func.func @transform_2(%arg0: i32) -> (i32, i32) {
    %c0_i32 = arith.constant 0 : i32
    %c0_i32_0 = arith.constant 0 : i32
    %c0_i32_1 = arith.constant 0 : i32
    return %c0_i32, %c0_i32_0 : i32, i32
  }
  func.func @transform_3(%arg0: i32) -> (i32, i32) {
    %c0_i32 = arith.constant 0 : i32
    %c0_i32_0 = arith.constant 0 : i32
    return %arg0, %c0_i32 : i32, i32
  }
}

</mosaic_0001>

<bundles_post_ra>
// kernel: tpu_custom_call.1
= control target key start
LH: loop header
LB: loop body
LE: loop exit
PB: predicated region body
PF: predicated region fallthrough
CT: control target
= control target key end

     0   :  { %s371_s0 = inlined_call_operand.vmem [shape: f32[8,4], index: 0, kind: input, shape index: {}]   ;;  %s372_s1 = inlined_call_operand.vmem [shape: f32[24,32], index: 1, kind: input, shape index: {}]   ;;  %s373_s2 = inlined_call_operand.vmem [shape: f32[192,8], index: 2, kind: input, shape index: {}]   ;;  %s374_s3 = inlined_call_operand.hbm [shape: f32[8,8], index: 3, kind: output, shape index: {}]  }
   0x1   :  { %v15_v0 = vld [vmem:[%s371_s0] sm:$0xff] }
   0x2   :  { %8 = vsyncpa [#allocation3], 0  ;;  %223 = vtanh.f32 %v15_v0  ;;  %s253_s14 = smov 12   ;;  %s254_s15 = smov 20   ;;  %v64_v17 = vld [vmem:[%s372_s1 + $0x10] sm:$0xff]  ;;  %v63_v18 = vld [vmem:[%s372_s1 + $0x8] sm:$0xff] }
   0x3   :  { %s255_s0 = smov 4   ;;  %s256_s16 = smov 16   ;;  %82 = vmatpush.msra.mxu0 %v64_v17  ;;  %v62_v19 = vld [vmem:[%s372_s1] sm:$0xff]  ;;  %vm52_vm0 = vcmask 31744   ;;  %vm54_vm1 = vcmask 64512   ;;  %vm56_vm2 = vcmask 97280  }
   0x4   :  { %s257_s17 = smov 8   ;;  %vm58_vm3 = vcmask 130048   ;;  %vm60_vm4 = vcmask 162816   ;;  %vm65_vm5 = vcmask 195584   ;;  %v151_v30 = vld [vmem:[%s373_s2 + $0xb8] sm:$0xff]  ;;  %v150_v31 = vld [vmem:[%s373_s2 + $0xb0] sm:$0xff] }
   0x5   :  { %83 = vmatpush.msra.mxu0 %v63_v18  ;;  %183 = vmatpush.msra.mxu2 %v151_v30  ;;  %v149_v32 = vld [vmem:[%s373_s2 + $0xa8] sm:$0xff]  ;;  %v143_v33 = vld [vmem:[%s373_s2 + $0x78] sm:$0xff]  ;;  %v148_v35 = vld [vmem:[%s373_s2 + $0xa0] sm:$0xff]  ;;  %s258_s12 = smov 32   ;;  %s259_s13 = smov 64   ;;  %vm121_vm6 = vcmask 261120  }
   0x6   :  { %155 = vmatpush.msra.mxu1 %v143_v33  ;;  %v147_v36 = vld [vmem:[%s373_s2 + $0x98] sm:$0xff]  ;;  %v146_v37 = vld [vmem:[%s373_s2 + $0x90] sm:$0xff]  ;;  %v145_v38 = vld [vmem:[%s373_s2 + $0x88] sm:$0xff]  ;;  %vm123_vm7 = vcmask 523264   ;;  %vm125_vm8 = vcmask 785408  }
   0x7   :  { %84 = vmatpush.msra.mxu0 %v62_v19  ;;  %184 = vmatpush.msra.mxu2 %v150_v31  ;;  %v142_v55 = vld [vmem:[%s373_s2 + $0x70] sm:$0xff]  ;;  %v144_v56 = vld [vmem:[%s373_s2 + $0x80] sm:$0xff]  ;;  %v141_v57 = vld [vmem:[%s373_s2 + $0x68] sm:$0xff] }
   0x8   :  { %v224_v1 = vpop.eup %223  ;;  %156 = vmatpush.msra.mxu1 %v142_v55  ;;  %v140_v58 = vld [vmem:[%s373_s2 + $0x60] sm:$0xff]  ;;  %v139_v59 = vld [vmem:[%s373_s2 + $0x58] sm:$0xff]  ;;  %v138_v60 = vld [vmem:[%s373_s2 + $0x50] sm:$0xff] }
   0x9   :  { %v17_v2 = vmul.f32 0.5, %v224_v1  ;;  %185 = vmatpush.msra.mxu2 %v149_v32  ;;  %v137_v61 = vld [vmem:[%s373_s2 + $0x48] sm:$0xff]  ;;  %v136_v62 = vld [vmem:[%s373_s2 + $0x40] sm:$0xff]  ;;  %v135_v63 = vld [vmem:[%s373_s2 + $0x38] sm:$0xff] }
   0xa   :  { %157 = vmatpush.msra.mxu1 %v141_v57  ;;  %v134_v0 = vld [vmem:[%s373_s2 + $0x30] sm:$0xff]  ;;  %v133_v1 = vld [vmem:[%s373_s2 + $0x28] sm:$0xff] }
   0xb   :  { %v18_v3 = vadd.f32 0.5, %v17_v2  ;;  %186 = vmatpush.msra.mxu2 %v148_v35  ;;  %v132_v2 = vld [vmem:[%s373_s2 + $0x20] sm:$0xff] }
   0xc   :  { %158 = vmatpush.msra.mxu1 %v140_v58 }
   0xd   :  { %v19_v4 = vsub.f32 1.0, %v18_v3  ;;  %v20_v5 = vmul.f32 %v18_v3, %v18_v3  ;;  %187 = vmatpush.msra.mxu2 %v147_v36 }
   0xe   :  { %159 = vmatpush.msra.mxu1 %v139_v59 }
   0xf   :  { %v21_v6 = vmul.f32 %v19_v4, %v19_v4  ;;  %v22_v7 = vmul.f32 %v20_v5, %v18_v3  ;;  %188 = vmatpush.msra.mxu2 %v146_v37 }
  0x10   :  { %160 = vmatpush.msra.mxu1 %v138_v60 }
  0x11   :  { %v23_v8 = vmul.f32 %v21_v6, %v19_v4  ;;  %v24_v9 = vmul.f32 %v22_v7, %v18_v3  ;;  %v30_v10 = vmul.f32 %v22_v7, %v21_v6  ;;  %189 = vmatpush.msra.mxu2 %v145_v38  ;;  %v128_v6 = vld [vmem:[%s373_s2] sm:$0xff] }
  0x12   :  { %161 = vmatpush.msra.mxu1 %v137_v61 }
  0x13   :  { %v25_v11 = vmul.f32 %v23_v8, %v19_v4  ;;  %41 = vrot.lane.b32.xlu1 %v30_v10, %s253_s14  ;;  %v26_v12 = vmul.f32 %v24_v9, %v18_v3  ;;  %v31_v15 = vmul.f32 %v24_v9, %v19_v4  ;;  %v29_v16 = vmul.f32 %v23_v8, %v20_v5  ;;  %s260_s14 = smov 96   ;;  %v129_v5 = vld [vmem:[%s373_s2 + $0x8] sm:$0xff] }
  0x14   :  { %190 = vmatpush.msra.mxu2 %v144_v56  ;;  %162 = vmatpush.msra.mxu1 %v136_v62 }
  0x15   :  { %v28_v13 = vmul.f32 %v25_v11, %v18_v3  ;;  %v27_v14 = vmul.f32 %v25_v11, %v19_v4  ;;  %49 = vrot.lane.b32.xlu2 %v26_v12, %s254_s15  ;;  %v131_v3 = vld [vmem:[%s373_s2 + $0x18] sm:$0xff]  ;;  %v130_v4 = vld [vmem:[%s373_s2 + $0x10] sm:$0xff]  ;;  %s203_s2 = sshll.u32 %s374_s3, 4  ;;  %s204_s2 = int_to_ptr.hbm [resolvable:$true] %s203_s2 }
  0x16   :  { %163 = vmatpush.msra.mxu1 %v135_v63 }
  0x17   :  { %33 = vrot.lane.b32.xlu0 %v28_v13, %s255_s0 }
  0x18   :  { %164 = vmatpush.msra.mxu1 %v134_v0 }
  0x1a   :  { %165 = vmatpush.msra.mxu1 %v133_v1 }
  0x1b   :  { %45 = vrot.lane.b32.xlu1 %v31_v15, %s256_s16 }
  0x1c   :  { %166 = vmatpush.msra.mxu1 %v132_v2 }
  0x1e   :  { %167 = vmatpush.msra.mxu1 %v131_v3 }
  0x1f   :  { %37 = vrot.lane.b32.xlu0 %v29_v16, %s257_s17  ;;  %s261_s17 = smov [#allocation2]  }
  0x20   :  { %168 = vmatpush.msra.mxu1 %v130_v4  ;;  %s201_s18 = sshll.u32 %s261_s17, 4  ;;  %s202_s18 = int_to_ptr.vmem [resolvable:$true] %s201_s18 }
  0x22   :  { %169 = vmatpush.msra.mxu1 %v129_v5 }
  0x24   :  { %170 = vmatpush.msra.mxu1 %v128_v6 }
  0x6f   :  { %v50_v26 = vpop.permute.xlu2 %49 }
  0x85   :  { %v42_v20 = vpop.permute.xlu1 %41 }
  0x89   :  { %v34_v21 = vpop.permute.xlu0 %33 }
  0x8a   :  { %v53_v22 = vsel %vm52_vm0, %v27_v14, %v34_v21 }
  0x8d   :  { %v46_v24 = vpop.permute.xlu1 %45 }
  0x91   :  { %v38_v23 = vpop.permute.xlu0 %37 }
  0x92   :  { %v55_v25 = vsel %vm54_vm1, %v53_v22, %v38_v23 }
  0x93   :  { %v57_v27 = vsel %vm56_vm2, %v55_v25, %v42_v20 }
  0x94   :  { %v59_v28 = vsel %vm58_vm3, %v57_v27, %v46_v24 }
  0x95   :  { %v61_v29 = vsel %vm60_vm4, %v59_v28, %v50_v26 }
  0x96   :  { %212 = vmatmul.msk.f32.vlgmr.msra.gmra.mxu0 %vm65_vm5, %v61_v29 }
 0x113   :  { %v86_v34 = vpop.f32.mrf.mxu0 }
 0x114   :  { %225 = vtanh.f32 %v86_v34 }
 0x11a   :  { %v226_v39 = vpop.eup %225 }
 0x11b   :  { %v90_v40 = vmul.f32 0.5, %v226_v39 }
 0x11d   :  { %v91_v41 = vadd.f32 0.5, %v90_v40 }
 0x11f   :  { %v93_v42 = vmul.f32 %v91_v41, %v91_v41  ;;  %v92_v43 = vsub.f32 1.0, %v91_v41 }
 0x121   :  { %v95_v44 = vmul.f32 %v93_v42, %v91_v41  ;;  %v94_v45 = vmul.f32 %v92_v43, %v92_v43 }
 0x123   :  { %v97_v46 = vmul.f32 %v95_v44, %v91_v41  ;;  %v96_v47 = vmul.f32 %v94_v45, %v92_v43  ;;  %v103_v54 = vmul.f32 %v95_v44, %v94_v45 }
 0x125   :  { %v99_v48 = vmul.f32 %v97_v46, %v91_v41  ;;  %v102_v49 = vmul.f32 %v96_v47, %v93_v42  ;;  %v98_v50 = vmul.f32 %v96_v47, %v92_v43  ;;  %v104_v51 = vmul.f32 %v97_v46, %v92_v43 }
 0x127   :  { %118 = vrot.lane.b32.xlu2 %v99_v48, %s258_s12  ;;  %110 = vrot.lane.b32.xlu1 %v102_v49, %s259_s13  ;;  %v101_v52 = vmul.f32 %v98_v50, %v91_v41  ;;  %v100_v53 = vmul.f32 %v98_v50, %v92_v43 }
 0x129   :  { %106 = vrot.lane.b32.xlu0 %v101_v52, %s258_s12 }
 0x12f   :  { %114 = vrot.lane.b32.xlu2 %v103_v54, %s260_s14 }
 0x181   :  { %v119_v7 = vpop.permute.xlu2 %118 }
 0x182   :  { %v127_v8 = vsel %vm121_vm6, %v104_v51, %v119_v7 }
 0x183   :  { %213 = vmatmul.msk.f32.vlgmr.msra.gmra.mxu2 %vm123_vm7, %v127_v8 }
 0x189   :  { %v115_v12 = vpop.permute.xlu2 %114 }
 0x199   :  { %v111_v10 = vpop.permute.xlu1 %110 }
 0x19b   :  { %v107_v9 = vpop.permute.xlu0 %106 }
 0x19c   :  { %v122_v11 = vsel %vm121_vm6, %v100_v53, %v107_v9 }
 0x19d   :  { %v124_v13 = vsel %vm123_vm7, %v122_v11, %v111_v10 }
 0x19e   :  { %v126_v14 = vsel %vm125_vm8, %v124_v13, %v115_v12 }
 0x19f   :  { %171 = vmatmul.f32.vlgmr.msra.gmra.mxu1 %v126_v14 }
 0x206   :  { %v192_v15 = vpop.f32.mrf.mxu2 }
 0x21c   :  { %v172_v16 = vpop.f32.mrf.mxu1 }
 0x21d   :  { %v193_v17 = vadd.f32 %v192_v15, %v172_v16 }
 0x21f   :  { %195 = vst.msk [vmem:[#allocation2] sm:$0xff] %vm54_vm1, %v193_v17 }
 0x220   :  { %206 = dma.vmem_to_hbm [thread:$0]  %s202_s18, 128, %s204_s2, [#allocation3]  }
 0x221   :  { %251 = dma.done.wait [#allocation3], 128  }
 0x222   :  { %252 = vsyncadd [#allocation3], 4294967168 }
 0x223   :  { %211 = vsyncpa [#allocation3], 1 }

</bundles_post_ra>
